<compile_context>
chip_gen: v7x
topology: tpu7x:2x2x1
jax: 0.10.0
libtpu: 0.0.40
codegen_flags: <defaults>
</compile_context>

<pallas_src>
import functools

import jax
import jax.numpy as jnp
from jax.experimental import pallas as pl
from jax.experimental.pallas import tpu as pltpu


# ----------------------------- fused kernel ----------------------------------

def _se_fused_kernel(x_ref, w1_ref, b1_ref, w2_ref, b2_ref, o_ref, *,
                     groups, group_len):
    # x_ref / o_ref : (1, R, G*L)   R rows on sublanes, G*L on lanes
    # w1_ref        : (G, R, HID)   first linear, regrouped (see prepare_se_params)
    # b1_ref        : (1, HID)
    # w2_ref        : (R, HID)      second linear (transposed / row-expanded)
    # b2_ref        : (R, 1)
    x = x_ref[0].astype(jnp.float32)                     # f32 accumulation/math

    inv_l = 1.0 / group_len

    # squeeze + first FC: per-(row, group) spatial mean folded straight into
    # the (in -> HID) linear as broadcast-mul + sublane reduce (tiny; rides
    # otherwise-idle XLU/VALU slots -- MXU not worth it at these sizes).
    h = b1_ref[...].astype(jnp.float32)                  # (1, HID)
    for g in range(groups):                              # static, G is 1 or T
        xg = x[:, g * group_len:(g + 1) * group_len]     # (R, L)
        p = jnp.sum(xg, axis=-1, keepdims=True) * inv_l  # (R, 1)
        h = h + jnp.sum(w1_ref[g].astype(jnp.float32) * p, axis=0, keepdims=True)
    h = jnp.maximum(h, 0.0)                              # ReLU

    # second FC -> per-row gate logit (lane reduce over HID)
    z = (jnp.sum(w2_ref[...].astype(jnp.float32) * h, axis=-1, keepdims=True)
         + b2_ref[...].astype(jnp.float32))              # (R, 1)

    # residual folded into the gate: x + x*y == x * (1 + y)
    gate = 1.0 + jax.nn.sigmoid(z)                       # (R, 1), f32 (EUP)

    o_ref[0] = (x * gate).astype(o_ref.dtype)


# ----------------------------- one-time weight prep --------------------------

def prepare_se_params(w1, b1, w2, b2, channel, temporal):
    """One-time (init) weight preparation -- hoisted out of the per-call path.

    w1: (C*T, HID), b1: (HID,), w2: (HID, C), b2: (C,)  [(in, out) storage].
    Builds both layout variants (both tiny); the wrapper picks per x shape.
    """
    C, T = channel, temporal
    CT = C * T
    HID = w1.shape[1]
    dtype = w1.dtype

    # Layout A (rows = (c, t), for H*W % 128 == 0): fold the per-channel ->
    # per-(c,t) gate duplication and the W2 transpose into the weights.
    # E[c*T + t, c] = 1 matches the row order of x.reshape(B, C*T, H*W).
    E = jnp.repeat(jnp.eye(C, dtype=dtype), T, axis=0)        # (CT, C)

    return {
        "b1": b1.reshape(1, HID),
        # layout A: rows = (c, t), single lane group
        "w1g_ct": w1.reshape(1, CT, HID),                     # (1, CT, HID)
        "w2_ct": E @ w2.T,                                    # (CT, HID)
        "b2_ct": E @ b2.reshape(C, 1),                        # (CT, 1)
        # layout B: rows = c, lane group per t (for H*W not a multiple of 128)
        "w1g_c": w1.reshape(C, T, HID).transpose(1, 0, 2),    # (T, C, HID)
        "w2_c": w2.T,                                         # (C, HID)
        "b2_c": b2.reshape(C, 1),                             # (C, 1)
    }


# ----------------------------- wrapper ---------------------------------------

def se_layer_3d(x, params, *, alias_input=False):
    """Fused SELayer3D forward.  x: (B, C, T, H, W); dtype f32 or bf16.

    Set alias_input=True (and donate x at the jit boundary) when the caller no
    longer needs x -- the output then reuses x's HBM buffer.
    """
    B, C, T, H, W = x.shape
    HW = H * W
    CT = C * T

    if HW % 128 == 0:
        # lane-dense primary layout: (B, C*T, H*W), gate per (c,t) row
        R, G, L = CT, 1, HW
        w1g, w2e, b2e = params["w1g_ct"], params["w2_ct"], params["b2_ct"]
    else:
        # fallback: (B, C, T*H*W) keeps the lane axis long/dense (avoids
        # lane-narrow masked stores for shapes like 14x14 / 7x7)
        R, G, L = C, T, HW
        w1g, w2e, b2e = params["w1g_c"], params["w2_c"], params["b2_c"]
    b1r = params["b1"]
    HID = b1r.shape[-1]

    xf = x.reshape(B, R, G * L)

    kernel = functools.partial(_se_fused_kernel, groups=G, group_len=L)

    # Explicit VMEM budget: double-buffered x block + out block (4x slab) plus
    # double-buffered (tiny) weights, ~1 MiB headroom.  Clamp to 64 MiB so the
    # request stays inside v7x's physical VMEM (v5e/v6e have 128 MiB).
    itemsize = jnp.dtype(x.dtype).itemsize
    block_bytes = R * G * L * itemsize
    w_itemsize = jnp.dtype(w1g.dtype).itemsize
    w_bytes = (w1g.size + b1r.size + w2e.size + b2e.size) * w_itemsize
    vmem_needed = 4 * block_bytes + 2 * w_bytes + (1 << 20)
    vmem_limit = int(min(max(vmem_needed, 32 * 1024 * 1024), 64 * 1024 * 1024))

    # Memory-bound hint for XLA's scheduler.
    cost = pl.CostEstimate(
        flops=3 * B * R * G * L,                 # pool sum + gated multiply
        transcendentals=B * R,                   # sigmoid per gate row
        bytes_accessed=2 * B * R * G * L * itemsize,
    )

    out = pl.pallas_call(
        kernel,
        out_shape=jax.ShapeDtypeStruct((B, R, G * L), x.dtype),
        grid=(B,),
        in_specs=[
            pl.BlockSpec((1, R, G * L), lambda b: (b, 0, 0)),   # x slab (resident)
            pl.BlockSpec((G, R, HID), lambda b: (0, 0, 0)),     # w1 (regrouped)
            pl.BlockSpec((1, HID), lambda b: (0, 0)),           # b1
            pl.BlockSpec((R, HID), lambda b: (0, 0)),           # w2 (expanded)
            pl.BlockSpec((R, 1), lambda b: (0, 0)),             # b2 (expanded)
        ],
        out_specs=pl.BlockSpec((1, R, G * L), lambda b: (b, 0, 0)),
        input_output_aliases={0: 0} if alias_input else {},
        compiler_params=pltpu.CompilerParams(
            dimension_semantics=("parallel",),   # keep B even for v7x megacore
            vmem_limit_bytes=vmem_limit),
        cost_estimate=cost,
    )(xf, w1g, b1r, w2e, b2e)

    return out.reshape(B, C, T, H, W)


# ----------------------------- reference (pure JAX) ---------------------------

def se_layer_3d_ref(x, w1, b1, w2, b2):
    B, C, T, H, W = x.shape
    p = jnp.mean(x.astype(jnp.float32), axis=(3, 4)).reshape(B, C * T)
    h = jnp.maximum(p @ w1 + b1, 0.0)
    y = jax.nn.sigmoid(h @ w2 + b2)
    y = y.reshape(B, C, 1, 1, 1)
    xf = x.astype(jnp.float32)
    return xf + xf * y


# ----------------------------- main -------------------------------------------

if __name__ == "__main__":
    B, C, T = 2, 8, 8
    reduction = 16
    CT = C * T
    HID = CT // reduction  # 4

    key = jax.random.PRNGKey(0)
    kx, kx2, k1, k2, k3, k4 = jax.random.split(key, 6)

    # deterministic synthetic parameters, stored as (in_features, out_features)
    w1 = jax.random.normal(k1, (CT, HID), dtype=jnp.float32) * (1.0 / jnp.sqrt(CT))
    b1 = jax.random.normal(k2, (HID,), dtype=jnp.float32) * 0.05
    w2 = jax.random.normal(k3, (HID, C), dtype=jnp.float32) * (1.0 / jnp.sqrt(HID))
    b2 = jax.random.normal(k4, (C,), dtype=jnp.float32) * 0.05

    # one-time weight prep (init), not in the per-call path
    params = prepare_se_params(w1, b1, w2, b2, C, T)

    # ---- primary lane-dense layout (H*W = 256, multiple of 128), f32 I/O ----
    H = Wd = 16
    x = jax.random.normal(kx, (B, C, T, H, Wd), dtype=jnp.float32)
    ref = se_layer_3d_ref(x, w1, b1, w2, b2)

    out = jax.block_until_ready(se_layer_3d(x, params))
    assert out.shape == (B, C, T, H, Wd)
    assert jnp.allclose(out, ref, atol=1e-4, rtol=1e-5), "f32 mismatch vs reference"

    # ---- bf16 HBM I/O (halves bytes, the dominant cost) with buffer aliasing.
    #      Kernel math stays f32.  In production, also donate x under jit so
    #      the alias avoids the defensive copy.  x_bf16 is not reused below.
    x_bf16 = x.astype(jnp.bfloat16)
    out_bf = jax.block_until_ready(se_layer_3d(x_bf16, params, alias_input=True))
    assert out_bf.dtype == jnp.bfloat16
    assert jnp.allclose(out_bf.astype(jnp.float32), ref, atol=5e-2, rtol=5e-2), \
        "bf16 mismatch vs reference"

    # ---- fallback layout: H*W = 144 (not a multiple of 128) -> (B, C, T*H*W)
    H2 = W2 = 12
    x2 = jax.random.normal(kx2, (B, C, T, H2, W2), dtype=jnp.float32)
    out2 = jax.block_until_ready(se_layer_3d(x2, params))
    ref2 = se_layer_3d_ref(x2, w1, b1, w2, b2)
    assert jnp.allclose(out2, ref2, atol=1e-4, rtol=1e-5), "fallback layout mismatch"

    print("KERNEL_OK")
</pallas_src>

<mosaic_0001>
module attributes {stable_mosaic.version = 11 : i64} {
  func.func @_se_fused_kernel(%arg0: i32, %arg1: memref<1x64x256xf32, #tpu.memory_space<vmem>>, %arg2: memref<1x64x4xf32, #tpu.memory_space<vmem>>, %arg3: memref<1x4xf32, #tpu.memory_space<vmem>>, %arg4: memref<64x4xf32, #tpu.memory_space<vmem>>, %arg5: memref<64x1xf32, #tpu.memory_space<vmem>>, %arg6: memref<1x64x256xf32, #tpu.memory_space<vmem>>) attributes {dimension_semantics = [#tpu.dimension_semantics<parallel>], iteration_bounds = array<i64: 2>, scalar_prefetch = 0 : i64, scratch_operands = 0 : i64, tpu.core_type = #tpu.core_type<tc>, window_params = [{transform_indices = @transform_0, window_bounds = array<i64: 1, 64, 256>}, {pipeline_mode = #tpu.pipeline_mode<synchronous>, transform_indices = @transform_1, window_bounds = array<i64: 1, 64, 4>}, {pipeline_mode = #tpu.pipeline_mode<synchronous>, transform_indices = @transform_2, window_bounds = array<i64: 1, 4>}, {pipeline_mode = #tpu.pipeline_mode<synchronous>, transform_indices = @transform_3, window_bounds = array<i64: 64, 4>}, {pipeline_mode = #tpu.pipeline_mode<synchronous>, transform_indices = @transform_4, window_bounds = array<i64: 64, 1>}, {transform_indices = @transform_5, window_bounds = array<i64: 1, 64, 256>}]} {
    %c0 = arith.constant 0 : index
    %c0_0 = arith.constant 0 : index
    %c0_1 = arith.constant 0 : index
    %0 = vector.load %arg1[%c0, %c0_0, %c0_1] : memref<1x64x256xf32, #tpu.memory_space<vmem>>, vector<1x64x256xf32>
    %1 = vector.shape_cast %0 : vector<1x64x256xf32> to vector<64x256xf32>
    %c0_2 = arith.constant 0 : index
    %c0_3 = arith.constant 0 : index
    %2 = vector.load %arg3[%c0_2, %c0_3] : memref<1x4xf32, #tpu.memory_space<vmem>>, vector<1x4xf32>
    %cst = arith.constant dense<0.000000e+00> : vector<64xf32>
    %3 = vector.multi_reduction <add>, %1, %cst [1] : vector<64x256xf32> to vector<64xf32>
    %4 = vector.shape_cast %3 : vector<64xf32> to vector<64x1xf32>
    %cst_4 = arith.constant 3.906250e-03 : f32
    %5 = vector.broadcast %cst_4 : f32 to vector<64x1xf32>
    %6 = arith.mulf %4, %5 : vector<64x1xf32>
    %c0_5 = arith.constant 0 : index
    %c0_6 = arith.constant 0 : index
    %c0_7 = arith.constant 0 : index
    %7 = vector.load %arg2[%c0_5, %c0_6, %c0_7] : memref<1x64x4xf32, #tpu.memory_space<vmem>>, vector<1x64x4xf32>
    %8 = vector.shape_cast %7 : vector<1x64x4xf32> to vector<64x4xf32>
    %9 = vector.broadcast %6 : vector<64x1xf32> to vector<64x4xf32>
    %10 = arith.mulf %8, %9 : vector<64x4xf32>
    %cst_8 = arith.constant dense<0.000000e+00> : vector<4xf32>
    %11 = vector.multi_reduction <add>, %10, %cst_8 [0] : vector<64x4xf32> to vector<4xf32>
    %12 = vector.shape_cast %11 : vector<4xf32> to vector<1x4xf32>
    %13 = arith.addf %2, %12 : vector<1x4xf32>
    %cst_9 = arith.constant 0.000000e+00 : f32
    %14 = vector.broadcast %cst_9 : f32 to vector<1x4xf32>
    %15 = arith.maximumf %13, %14 : vector<1x4xf32>
    %c0_10 = arith.constant 0 : index
    %c0_11 = arith.constant 0 : index
    %16 = vector.load %arg4[%c0_10, %c0_11] : memref<64x4xf32, #tpu.memory_space<vmem>>, vector<64x4xf32>
    %17 = vector.broadcast %15 : vector<1x4xf32> to vector<64x4xf32>
    %18 = arith.mulf %16, %17 : vector<64x4xf32>
    %cst_12 = arith.constant dense<0.000000e+00> : vector<64xf32>
    %19 = vector.multi_reduction <add>, %18, %cst_12 [1] : vector<64x4xf32> to vector<64xf32>
    %20 = vector.shape_cast %19 : vector<64xf32> to vector<64x1xf32>
    %c0_13 = arith.constant 0 : index
    %c0_14 = arith.constant 0 : index
    %21 = vector.load %arg5[%c0_13, %c0_14] : memref<64x1xf32, #tpu.memory_space<vmem>>, vector<64x1xf32>
    %22 = arith.addf %20, %21 : vector<64x1xf32>
    %23 = arith.negf %22 : vector<64x1xf32>
    %24 = math.exp %23 : vector<64x1xf32>
    %cst_15 = arith.constant 1.000000e+00 : f32
    %25 = vector.broadcast %cst_15 : f32 to vector<64x1xf32>
    %26 = arith.addf %25, %24 : vector<64x1xf32>
    %27 = arith.divf %25, %26 : vector<64x1xf32>
    %cst_16 = arith.constant 1.000000e+00 : f32
    %28 = vector.broadcast %cst_16 : f32 to vector<64x1xf32>
    %29 = arith.addf %28, %27 : vector<64x1xf32>
    %30 = vector.broadcast %29 : vector<64x1xf32> to vector<64x256xf32>
    %31 = arith.mulf %1, %30 : vector<64x256xf32>
    %c0_17 = arith.constant 0 : index
    %c0_18 = arith.constant 0 : index
    %c0_19 = arith.constant 0 : index
    %32 = vector.load %arg6[%c0_17, %c0_18, %c0_19] : memref<1x64x256xf32, #tpu.memory_space<vmem>>, vector<1x64x256xf32>
    %33 = vector.shape_cast %32 : vector<1x64x256xf32> to vector<64x256xf32>
    %34 = vector.shape_cast %31 : vector<64x256xf32> to vector<1x64x256xf32>
    tpu.vector_store %arg6[%c0_17, %c0_18, %c0_19], %34 {strides = array<i32>} : memref<1x64x256xf32, #tpu.memory_space<vmem>>, vector<1x64x256xf32>,
    return
  }
  func.func @transform_0(%arg0: i32) -> (i32, i32, i32) {
    %c0_i32 = arith.constant 0 : i32
    %c0_i32_0 = arith.constant 0 : i32
    %c0_i32_1 = arith.constant 0 : i32
    return %arg0, %c0_i32, %c0_i32_0 : i32, i32, i32
  }
  func.func @transform_1(%arg0: i32) -> (i32, i32, i32) {
    %c0_i32 = arith.constant 0 : i32
    %c0_i32_0 = arith.constant 0 : i32
    %c0_i32_1 = arith.constant 0 : i32
    %c0_i32_2 = arith.constant 0 : i32
    return %c0_i32, %c0_i32_0, %c0_i32_1 : i32, i32, i32
  }
  func.func @transform_2(%arg0: i32) -> (i32, i32) {
    %c0_i32 = arith.constant 0 : i32
    %c0_i32_0 = arith.constant 0 : i32
    %c0_i32_1 = arith.constant 0 : i32
    return %c0_i32, %c0_i32_0 : i32, i32
  }
  func.func @transform_3(%arg0: i32) -> (i32, i32) {
    %c0_i32 = arith.constant 0 : i32
    %c0_i32_0 = arith.constant 0 : i32
    %c0_i32_1 = arith.constant 0 : i32
    return %c0_i32, %c0_i32_0 : i32, i32
  }
  func.func @transform_4(%arg0: i32) -> (i32, i32) {
    %c0_i32 = arith.constant 0 : i32
    %c0_i32_0 = arith.constant 0 : i32
    %c0_i32_1 = arith.constant 0 : i32
    return %c0_i32, %c0_i32_0 : i32, i32
  }
  func.func @transform_5(%arg0: i32) -> (i32, i32, i32) {
    %c0_i32 = arith.constant 0 : i32
    %c0_i32_0 = arith.constant 0 : i32
    %c0_i32_1 = arith.constant 0 : i32
    return %arg0, %c0_i32, %c0_i32_0 : i32, i32, i32
  }
}

</mosaic_0001>

<bundles_post_ra>
// kernel: tpu_custom_call.1
= control target key start
LH: loop header
LB: loop body
LE: loop exit
PB: predicated region body
PF: predicated region fallthrough
CT: control target
= control target key end

     0   :  { %10 = vsyncpa [#allocation3], 0  ;;  %s1193_s0 = inlined_call_operand.hbm [shape: f32[2,64,256], index: 0, kind: input, shape index: {}]   ;;  %s1194_s1 = inlined_call_operand.vmem [shape: f32[1,64,4], index: 1, kind: input, shape index: {}]   ;;  %s1195_s2 = inlined_call_operand.vmem [shape: f32[1,4], index: 2, kind: input, shape index: {}]   ;;  %s1196_s3 = inlined_call_operand.vmem [shape: f32[64,4], index: 3, kind: input, shape index: {}]   ;;  %s1197_s4 = inlined_call_operand.vmem [shape: f32[64,1], index: 4, kind: input, shape index: {}]   ;;  %s1198_s5 = inlined_call_operand.hbm [shape: f32[2,64,256], index: 5, kind: output, shape index: {}]  }
   0x1   :  { %12 = vsyncpa [#allocation3 + $0x1], 0 }
   0x2   :  { %13 = vsyncpa [#allocation4], 0 }
   0x3   :  { %15 = vsyncpa [#allocation4 + $0x1], 0  ;;  %s853_s18 = smov 0   ;;  %s855_s19 = smov 0  }
   0x4   :  { %s857_s20 = smov 0   ;;  %s859_s21 = smov 0  }
   0x5 LB: > { %s874_s22 = sadd.s32 4294967295, %s814_s21   ;;  %s609_s23 = sadd.s32 4294967294, %s814_s21   ;;  %s814_s21 = sphi %s859_s21, %s1211_s21   ;;  %s810_s20 = sphi %s857_s20, %s1210_s20   ;;  %s806_s19 = sphi %s855_s19, %s1209_s19   ;;  %s802_s18 = sphi %s853_s18, %s1208_s18  }
   0x6   : > { %s878_s24 = sadd.s32 1, %s814_s21   ;;  %s28_s25 = sadd.s32 1, %s810_s20 }
   0x7   : > { %s25_s26 = ssub.s32 %s814_s21, %s878_s24  ;;  %p35_p0 = scmp.ne.s32.totalorder %s810_s20, %s806_s19 }
   0x8   : > { %p26_p1 = scmp.eq.s32.totalorder %s25_s26, 0  ;;  %p36_p2 = scmp.eq.s32.totalorder %s814_s21, 0 }
   0x9   : > { %p41_p3 = scmp.ne.s32.totalorder %s806_s19, %s802_s18  ;;  %p42_p4 = scmp.eq.s32.totalorder %s874_s22, 0 }
   0xa   : > { %s890_s27 = scalar_select %p26_p1, %s810_s20, %s28_s25  }
   0xb   : > { %p892_p5 = por %p36_p2, %p35_p0  ;;  %p896_p6 = por %p42_p4, %p41_p3 }
   0xc   : > { %p149_p7 = scmp.eq.s32.totalorder %s874_s22, 1  ;;  %p155_p8 = scmp.eq.s32.totalorder %s609_s23, 1 }
   0xd   : > { %p645_p10 = scmp.lt.s32.totalorder %s814_s21, 2  ;;  %s187_s7 = sand.u32 1, %s810_s20  }
   0xe   : > { %p903_p11 = por %p149_p7, %p35_p0  ;;  %p907_p12 = por %p155_p8, %p41_p3 }
   0xf   : > { %s631_s8 = sshll.u32 %s814_s21, 11  ;;  %s612_s9 = sshll.u32 %s187_s7, 7 }
  0x10   : > { %s1202_s30 = scalar_select %p903_p11, 1, 0 }
  0x11   : > { %s1203_s6 = scalar_select %p907_p12, 1, 0 }
  0x12   : > { %s916_s12 = scalar_lea.hbm %s1193_s0, %s631_s8  ;;  %s191_s13 = scalar_lea.vmem [#allocation2], %s612_s9 }
  0x13   : > { %s198_s14 = sshll.u32 %s191_s13, 4  ;;  %p920_p13 = pnand %p645_p10, %p892_p5  ;;  %s924_s14 = int_to_ptr.vmem [resolvable:$true] %s198_s14 }
  0x14   : > { %s926_s16 = scalar_lea.sflag [#allocation3], %s187_s7  ;;  %s718_s17 = scalar_lea.hbm %s916_s12, 2048 }
  0x15   : > { %p719_p0 = scmp.ne.s32.totalorder %s916_s12, %s718_s17  ;;  %p720_p1 = pneg %p920_p13 }
  0x16   : > { %s723_s26 = scalar_lea.hbm %s1193_s0, 4096  ;;  %p724_p4 = scmp.lt.u32.totalorder %s916_s12, %s1193_s0 }
  0x17   : > { %p721_p2 = pnand %p720_p1, %p719_p0  ;;  %p725_p5 = scmp.lt.u32.totalorder %s723_s26, %s718_s17 }
  0x18   : > { %p727_p8 = scmp.lt.u32.totalorder %s718_s17, %s916_s12 }
  0x19   : > { %p722_p3 = pneg %p721_p2  ;;  %p726_p7 = por %p725_p5, %p724_p4 }
  0x1b   : > { %p728_p10 = por %p727_p8, %p726_p7 }
  0x1d   : > { %p729_p9 = pnand %p728_p10, %p722_p3 }
  0x1f   : > { %732 = shalt.err (!%p729_p9)
}
  0x20   : > { %s733_s7 = scalar_lea.vmem %s924_s14, 2048  ;;  %s816_s9 = smov [#allocation2]  }
  0x21   : > { %p734_p0 = scmp.ne.s32.totalorder %s924_s14, %s733_s7  ;;  %s738_s10 = sshll.u32 %s816_s9, 4  ;;  %s739_s10 = int_to_ptr.vmem [resolvable:$false] %s738_s10 }
  0x22   : > { %s740_s11 = scalar_lea.vmem %s739_s10, 4096  ;;  %p741_p11 = scmp.lt.s32.totalorder %s924_s14, %s739_s10 }
  0x23   : > { %p736_p2 = pnand %p734_p0, %p720_p1  ;;  %p742_p4 = scmp.lt.s32.totalorder %s740_s11, %s733_s7 }
  0x25   : > { %p737_p12 = pneg %p736_p2  ;;  %p743_p5 = por %p742_p4, %p741_p11 }
  0x27   : > { %p744_p7 = pnand %p743_p5, %p737_p12 }
  0x29   : > { %747 = shalt.err (!%p744_p7)
}
  0x2a   : > { %s817_s13 = smov 256   ;;  %s818_s17 = smov 16  }
  0x2b   : > { %640 = dma.hbm_to_vmem [thread:$0]  (!%p920_p13), %s916_s12, 2048, %s924_s14, %s926_s16, %s817_s13, %s817_s13, %s818_s17  }
  0x2c   : > { %p615_p9 = scmp.ge.s32.totalorder %s814_s21, 1  ;;  %p206_p1 = scmp.lt.s32.totalorder %s814_s21, 3 }
  0x2e   : > { %p207_p3 = pnand %p615_p9, %p206_p1 }
  0x2f   : > { %s957_s23 = sand.u32 (!%p207_p3), 1, %s806_s19  }
  0x30   : > { %210 = sbr.rel (%p207_p3) target bundleno = 587 (0x24b), region = 40  ;;  %s616_s25 = sshll.u32 (!%p207_p3), %s957_s23, 7 }
  0x31   : > { %s213_s26 = scalar_lea.sflag (!%p207_p3), [#allocation3], %s957_s23  ;;  %s216_s28 = scalar_lea.vmem (!%p207_p3), [#allocation2], %s616_s25 }
  0x37   : > { %793 = dma.done.wait (%p896_p6), %s213_s26, 2048  }
  0x38   : > { %795 = vsyncadd (%p896_p6), %s213_s26, 4294965248  ;;  %v967_v0 = vld [vmem:[%s216_s28] sm:$0xff]  ;;  %v969_v1 = vld [vmem:[%s216_s28 + $0x8] sm:$0xff]  ;;  %vm308_vm0 = vcmask 31744   ;;  %s1112_s10 = scalar_lea.vmem [#allocation5], %s616_s25  ;;  %s632_s25 = sshll.u32 %s874_s22, 11 }
  0x39   : > { %v971_v2 = vld [vmem:[%s216_s28 + $0x20] sm:$0xff]  ;;  %v260_v3 = vadd.f32 %v969_v1, %v967_v0  ;;  %v975_v4 = vld [vmem:[%s216_s28 + $0x28] sm:$0xff]  ;;  %v977_v5 = vld [vmem:[%s216_s28 + $0x10] sm:$0xff]  ;;  %s536_s11 = sshll.u32 %s1112_s10, 4  ;;  %s1143_s26 = scalar_lea.hbm %s1198_s5, %s632_s25  ;;  %s1145_s11 = int_to_ptr.vmem [resolvable:$true] %s536_s11 }
  0x3a   : > { %v979_v6 = vld [vmem:[%s216_s28 + $0x18] sm:$0xff]  ;;  %v266_v7 = vadd.f32 %v975_v4, %v971_v2  ;;  %v983_v8 = vld [vmem:[%s216_s28 + $0x30] sm:$0xff]  ;;  %v991_v12 = vld [vmem:[%s216_s28 + $0x40] sm:$0xff]  ;;  %s523_s22 = scalar_lea.sflag [#allocation4], %s957_s23  ;;  %p1205_p11 = scmp.ne.s32.totalorder %s1202_s30, 0 }
  0x3b   : > { %v985_v9 = vld [vmem:[%s216_s28 + $0x38] sm:$0xff]  ;;  %261 = vadd.xlane.f32.xlu0 %v260_v3  ;;  %v263_v10 = vadd.f32 %v979_v6, %v977_v5  ;;  %v993_v13 = vld [vmem:[%s216_s28 + $0x48] sm:$0xff]  ;;  %v995_v14 = vld [vmem:[%s216_s28 + $0x50] sm:$0xff]  ;;  %s820_s29 = smov [#allocation5]  }
  0x3c   : > { %267 = vadd.xlane.f32.xlu1 %v266_v7  ;;  %v269_v11 = vadd.f32 %v985_v9, %v983_v8  ;;  %v997_v15 = vld [vmem:[%s216_s28 + $0x58] sm:$0xff]  ;;  %v272_v16 = vadd.f32 %v993_v13, %v991_v12  ;;  %v1003_v18 = vld [vmem:[%s216_s28 + $0x60] sm:$0xff]  ;;  %v1005_v19 = vld [vmem:[%s216_s28 + $0x68] sm:$0xff]  ;;  %s752_s12 = sshll.u32 %s820_s29, 4  ;;  %s753_s12 = int_to_ptr.vmem [resolvable:$false] %s752_s12 }
  0x3d   : > { %v275_v17 = vadd.f32 %v997_v15, %v995_v14  ;;  %v1007_v20 = vld [vmem:[%s216_s28 + $0x70] sm:$0xff]  ;;  %v1009_v21 = vld [vmem:[%s216_s28 + $0x78] sm:$0xff]  ;;  %v278_v22 = vadd.f32 %v1005_v19, %v1003_v18  ;;  %v292_v27 = vld [vmem:[%s1194_s1] sm:$0xff]  ;;  %s748_s28 = scalar_lea.vmem %s1145_s11, 2048  ;;  %s754_s14 = scalar_lea.vmem %s753_s12, 4096 }
  0x3e   : > { %v281_v23 = vadd.f32 %v1009_v21, %v1007_v20  ;;  %v294_v29 = vld [vmem:[%s1194_s1 + $0x10] sm:$0xff]  ;;  %v293_v30 = vld [vmem:[%s1194_s1 + $0x8] sm:$0xff]  ;;  %v295_v34 = vld [vmem:[%s1194_s1 + $0x18] sm:$0xff]  ;;  %p749_p6 = scmp.ne.s32.totalorder %s1145_s11, %s748_s28  ;;  %p755_p8 = scmp.lt.s32.totalorder %s1145_s11, %s753_s12 }
  0x3f   : > { %264 = vadd.xlane.f32.xlu0 %v263_v10  ;;  %v296_v40 = vld [vmem:[%s1194_s1 + $0x20] sm:$0xff]  ;;  %v297_v45 = vld [vmem:[%s1194_s1 + $0x28] sm:$0xff]  ;;  %v298_v54 = vld [vmem:[%s1194_s1 + $0x30] sm:$0xff]  ;;  %p756_p10 = scmp.lt.s32.totalorder %s754_s14, %s748_s28 }
  0x40   : > { %270 = vadd.xlane.f32.xlu1 %v269_v11  ;;  %v299_v58 = vld [vmem:[%s1194_s1 + $0x38] sm:$0xff]  ;;  %p750_p12 = pnand %p749_p6, %p1205_p11 }
  0x41   : > { %p757_p0 = por %p756_p10, %p755_p8 }
  0x42   : > { %p751_p13 = pneg %p750_p12 }
  0x43   : > { %273 = vadd.xlane.f32.xlu0 %v272_v16 }
  0x44   : > { %276 = vadd.xlane.f32.xlu1 %v275_v17  ;;  %p758_p2 = pnand %p757_p0, %p751_p13 }
  0x47   : > { %279 = vadd.xlane.f32.xlu0 %v278_v22 }
  0x48   : > { %282 = vadd.xlane.f32.xlu1 %v281_v23 }
  0xc8   : > { %v262_v24 = vpop.xlane.xlu0 %261 }
  0xc9   : > { %v284_v25 = vmul.f32 0.00390625, %v262_v24  ;;  %v268_v26 = vpop.xlane.xlu1 %267 }
  0xca   : > { %v286_v28 = vmul.f32 0.00390625, %v268_v26 }
  0xcb   : > { %v300_v32 = vmul.f32 %v292_v27, %v284_v25  ;;  %v341_v25 = vlaneseq }
  0xcc   : > { %v265_v31 = vpop.xlane.xlu0 %264  ;;  %v302_v37 = vmul.f32 %v294_v29, %v286_v28 }
  0xcd   : > { %v285_v33 = vmul.f32 0.00390625, %v265_v31  ;;  %v271_v35 = vpop.xlane.xlu1 %270  ;;  %v309_v42 = vsel %vm308_vm0, %v300_v32, 0.0  ;;  %v342_v28 = vshrl.u32 %v341_v25, 7 }
  0xce   : > { %v287_v36 = vmul.f32 0.00390625, %v271_v35  ;;  %v312_v49 = vsel %vm308_vm0, %v302_v37, 0.0  ;;  %v333_v35 = vld [vmem:[%s1196_s3 + $0x8] sm:$0xff] }
  0xcf   : > { %v301_v38 = vmul.f32 %v293_v30, %v285_v33  ;;  %v259_v30 = vld [vmem:[%s1195_s2] sm:$0x1]  ;;  %v343_v32 = vsub.s32 0, %v342_v28 }
  0xd0   : > { %v303_v39 = vmul.f32 %v295_v34, %v287_v36  ;;  %v274_v41 = vpop.xlane.xlu0 %273  ;;  %v332_v36 = vld [vmem:[%s1196_s3] sm:$0xff] }
  0xd1   : > { %v310_v43 = vsel %vm308_vm0, %v301_v38, 0.0  ;;  %v288_v44 = vmul.f32 0.00390625, %v274_v41  ;;  %v277_v46 = vpop.xlane.xlu1 %276  ;;  %v335_v38 = vld [vmem:[%s1196_s3 + $0x18] sm:$0xff]  ;;  %v382_v28 = vld [vmem:[%s1197_s4 + $0x20] sm:$0xff] }
  0xd2   : > { %v311_v47 = vadd.f32 %v310_v43, %v309_v42  ;;  %v289_v48 = vmul.f32 0.00390625, %v277_v46  ;;  %v314_v50 = vsel %vm308_vm0, %v303_v39, 0.0  ;;  %v334_v39 = vld [vmem:[%s1196_s3 + $0x10] sm:$0xff]  ;;  %v337_v46 = vld [vmem:[%s1196_s3 + $0x28] sm:$0xff] }
  0xd3   : > { %v304_v51 = vmul.f32 %v296_v40, %v288_v44 }
  0xd4   : > { %v313_v52 = vadd.f32 %v312_v49, %v311_v47  ;;  %v305_v53 = vmul.f32 %v297_v45, %v289_v48  ;;  %v280_v55 = vpop.xlane.xlu0 %279  ;;  %v336_v47 = vld [vmem:[%s1196_s3 + $0x20] sm:$0xff] }
  0xd5   : > { %v316_v56 = vsel %vm308_vm0, %v304_v51, 0.0  ;;  %v290_v57 = vmul.f32 0.00390625, %v280_v55  ;;  %v283_v59 = vpop.xlane.xlu1 %282 }
  0xd6   : > { %v315_v60 = vadd.f32 %v314_v50, %v313_v52  ;;  %v291_v61 = vmul.f32 0.00390625, %v283_v59  ;;  %v318_v62 = vsel %vm308_vm0, %v305_v53, 0.0  ;;  %v339_v52 = vld [vmem:[%s1196_s3 + $0x38] sm:$0xff]  ;;  %v338_v53 = vld [vmem:[%s1196_s3 + $0x30] sm:$0xff] }
  0xd7   : > { %v306_v63 = vmul.f32 %v298_v54, %v290_v57 }
  0xd8   : > { %v317_v3 = vadd.f32 %v316_v56, %v315_v60  ;;  %v307_v7 = vmul.f32 %v299_v58, %v291_v61  ;;  %v819_v60 = vmov 0   ;;  %v379_v61 = vld [vmem:[%s1197_s4 + $0x8] sm:$0xff] }
  0xd9   : > { %v320_v10 = vsel %vm308_vm0, %v306_v63, 0.0  ;;  %685 = vset.pattern.permute.xlu1 %v819_v60  ;;  %684 = vset.pattern.permute.xlu0 %v819_v60 }
  0xda   : > { %v319_v11 = vadd.f32 %v318_v62, %v317_v3  ;;  %v322_v16 = vsel %vm308_vm0, %v307_v7, 0.0  ;;  %v378_v62 = vld [vmem:[%s1197_s4] sm:$0xff] }
  0xdc   : > { %v321_v17 = vadd.f32 %v320_v10, %v319_v11  ;;  %v381_v11 = vld [vmem:[%s1197_s4 + $0x18] sm:$0xff] }
  0xde   : > { %v323_v22 = vadd.f32 %v322_v16, %v321_v17  ;;  %v380_v16 = vld [vmem:[%s1197_s4 + $0x10] sm:$0xff] }
  0xe0   : > { %v324_v23 = vrot.slane %v323_v22, 4 }
  0xe2   : > { %v325_v24 = vadd.f32 %v324_v23, %v323_v22 }
  0xe4   : > { %v326_v26 = vrot.slane %v325_v24, 2 }
  0xe6   : > { %v327_v27 = vadd.f32 %v326_v26, %v325_v24 }
  0xe8   : > { %v328_v29 = vrot.slane %v327_v27, 1 }
  0xea   : > { %v329_v31 = vadd.f32 %v328_v29, %v327_v27  ;;  %v383_v27 = vld [vmem:[%s1197_s4 + $0x28] sm:$0xff] }
  0xec   : > { %v330_v33 = vadd.f32 %v329_v31, %v259_v30 }
  0xee   : > { %v331_v34 = vmax.f32 %v330_v33, 0.0 }
  0xf0   : > { %v344_v37 = vrot.slane %v331_v34, %v343_v32 }
  0xf2   : > { %v347_v40 = vmul.f32 %v344_v37, %v333_v35  ;;  %v346_v41 = vmul.f32 %v344_v37, %v332_v36  ;;  %v349_v44 = vmul.f32 %v344_v37, %v335_v38  ;;  %v348_v45 = vmul.f32 %v344_v37, %v334_v39  ;;  %v384_v35 = vld [vmem:[%s1197_s4 + $0x30] sm:$0xff]  ;;  %v385_v39 = vld [vmem:[%s1197_s4 + $0x38] sm:$0xff] }
  0xf3   : > { %v351_v50 = vmul.f32 %v344_v37, %v337_v46  ;;  %v350_v51 = vmul.f32 %v344_v37, %v336_v47  ;;  %v353_v56 = vmul.f32 %v344_v37, %v339_v52  ;;  %v352_v57 = vmul.f32 %v344_v37, %v338_v53 }
  0xf4   : > { %v357_v42 = vsel %vm308_vm0, %v347_v40, 0.0  ;;  %v354_v43 = vsel %vm308_vm0, %v346_v41, 0.0  ;;  %v363_v48 = vsel %vm308_vm0, %v349_v44, 0.0  ;;  %v360_v49 = vsel %vm308_vm0, %v348_v45, 0.0 }
  0xf5   : > { %358 = vadd.xlane.f32.xlu1 %v357_v42  ;;  %355 = vadd.xlane.f32.xlu0 %v354_v43  ;;  %v369_v54 = vsel %vm308_vm0, %v351_v50, 0.0  ;;  %v366_v55 = vsel %vm308_vm0, %v350_v51, 0.0  ;;  %v375_v58 = vsel %vm308_vm0, %v353_v56, 0.0  ;;  %v372_v59 = vsel %vm308_vm0, %v352_v57, 0.0 }
  0xf9   : > { %364 = vadd.xlane.f32.xlu1 %v363_v48  ;;  %361 = vadd.xlane.f32.xlu0 %v360_v49 }
  0xfd   : > { %370 = vadd.xlane.f32.xlu1 %v369_v54  ;;  %367 = vadd.xlane.f32.xlu0 %v366_v55 }
 0x101   : > { %376 = vadd.xlane.f32.xlu1 %v375_v58  ;;  %373 = vadd.xlane.f32.xlu0 %v372_v59 }
 0x182   : > { %v359_v63 = vpop.xlane.xlu1 %358  ;;  %v356_v3 = vpop.xlane.xlu0 %355 }
 0x183   : > { %v387_v7 = vadd.f32 %v379_v61, %v359_v63  ;;  %v386_v10 = vadd.f32 %v378_v62, %v356_v3 }
 0x185   : > { %v619_v17 = vmul.f32 -1.442695, %v387_v7  ;;  %v618_v22 = vmul.f32 -1.442695, %v386_v10 }
 0x186   : > { %v365_v23 = vpop.xlane.xlu1 %364  ;;  %v362_v24 = vpop.xlane.xlu0 %361 }
 0x187   : > { %686 = vpow2.f32 %v619_v17  ;;  %v389_v25 = vadd.f32 %v381_v11, %v365_v23  ;;  %v388_v26 = vadd.f32 %v380_v16, %v362_v24 }
 0x188   : > { %688 = vpow2.f32 %v618_v22 }
 0x189   : > { %v621_v29 = vmul.f32 -1.442695, %v389_v25  ;;  %v620_v30 = vmul.f32 -1.442695, %v388_v26 }
 0x18a   : > { %v371_v31 = vpop.xlane.xlu1 %370  ;;  %v368_v32 = vpop.xlane.xlu0 %367 }
 0x18b   : > { %690 = vpow2.f32 %v621_v29  ;;  %v391_v33 = vadd.f32 %v383_v27, %v371_v31  ;;  %v390_v34 = vadd.f32 %v382_v28, %v368_v32 }
 0x18c   : > { %692 = vpow2.f32 %v620_v30 }
 0x18d   : > { %v622_v36 = vmul.f32 -1.442695, %v390_v34  ;;  %v623_v37 = vmul.f32 -1.442695, %v391_v33 }
 0x18e   : > { %v374_v38 = vpop.xlane.xlu0 %373  ;;  %v377_v40 = vpop.xlane.xlu1 %376 }
 0x18f   : > { %v392_v41 = vadd.f32 %v384_v35, %v374_v38  ;;  %694 = vpow2.f32 %v622_v36  ;;  %v393_v45 = vadd.f32 %v385_v39, %v377_v40 }
 0x190   : > { %696 = vpow2.f32 %v623_v37 }
 0x191   : > { %v687_v42 = vpop.eup %686  ;;  %v624_v46 = vmul.f32 -1.442695, %v392_v41  ;;  %v625_v50 = vmul.f32 -1.442695, %v393_v45 }
 0x192   : > { %v689_v43 = vpop.eup %688  ;;  %v419_v44 = vadd.f32 1.0, %v687_v42 }
 0x193   : > { %v418_v47 = vadd.f32 1.0, %v689_v43 }
 0x194   : > { %698 = vrcp.f32 %v419_v44 }
 0x195   : > { %v691_v48 = vpop.eup %690  ;;  %700 = vrcp.f32 %v418_v47 }
 0x196   : > { %v693_v49 = vpop.eup %692  ;;  %702 = vpow2.f32 %v624_v46  ;;  %v421_v51 = vadd.f32 1.0, %v691_v48 }
 0x197   : > { %v420_v52 = vadd.f32 1.0, %v693_v49 }
 0x199   : > { %704 = vrcp.f32 %v420_v52  ;;  %v695_v53 = vpop.eup %694 }
 0x19a   : > { %706 = vpow2.f32 %v625_v50  ;;  %v422_v54 = vadd.f32 1.0, %v695_v53  ;;  %v697_v55 = vpop.eup %696 }
 0x19b   : > { %708 = vrcp.f32 %v421_v51  ;;  %v423_v58 = vadd.f32 1.0, %v697_v55 }
 0x19c   : > { %710 = vrcp.f32 %v422_v54 }
 0x19d   : > { %712 = vrcp.f32 %v423_v58 }
 0x19e   : > { %v699_v56 = vpop.eup %698 }
 0x19f   : > { %v701_v57 = vpop.eup %700  ;;  %v443_v59 = vadd.f32 1.0, %v699_v56 }
 0x1a0   : > { %v703_v60 = vpop.eup %702  ;;  %v442_v61 = vadd.f32 1.0, %v701_v57 }
 0x1a1   : > { %457 = vperm.xlu1 %685, %v443_v59   ;;  %v424_v63 = vadd.f32 1.0, %v703_v60 }
 0x1a2   : > { %452 = vperm.xlu0 %684, %v442_v61  }
 0x1a3   : > { %v705_v62 = vpop.eup %704  ;;  %714 = vrcp.f32 %v424_v63 }
 0x1a4   : > { %v707_v3 = vpop.eup %706  ;;  %v444_v7 = vadd.f32 1.0, %v705_v62 }
 0x1a5   : > { %v709_v10 = vpop.eup %708  ;;  %v425_v11 = vadd.f32 1.0, %v707_v3 }
 0x1a6   : > { %462 = vperm.xlu1 %685, %v444_v7   ;;  %v445_v16 = vadd.f32 1.0, %v709_v10  ;;  %v711_v17 = vpop.eup %710 }
 0x1a7   : > { %716 = vrcp.f32 %v425_v11  ;;  %v446_v22 = vadd.f32 1.0, %v711_v17  ;;  %v713_v23 = vpop.eup %712 }
 0x1a8   : > { %v447_v24 = vadd.f32 1.0, %v713_v23 }
 0x1aa   : > { %467 = vperm.xlu1 %685, %v445_v16  }
 0x1ad   : > { %v715_v25 = vpop.eup %714 }
 0x1ae   : > { %472 = vperm.xlu1 %685, %v446_v22   ;;  %v448_v26 = vadd.f32 1.0, %v715_v25 }
 0x1b1   : > { %v717_v27 = vpop.eup %716 }
 0x1b2   : > { %477 = vperm.xlu1 %685, %v447_v24   ;;  %v449_v28 = vadd.f32 1.0, %v717_v27 }
 0x1b6   : > { %482 = vperm.xlu1 %685, %v448_v26  }
 0x1ba   : > { %487 = vperm.xlu1 %685, %v449_v28  }
 0x220   : > { %v458_v29 = vpop.permute.xlu1 %457 }
 0x221   : > { %v492_v30 = vmul.f32 %v458_v29, %v977_v5  ;;  %v493_v31 = vmul.f32 %v458_v29, %v979_v6  ;;  %v453_v32 = vpop.permute.xlu0 %452 }
 0x222   : > { %v490_v33 = vmul.f32 %v453_v32, %v967_v0  ;;  %v491_v34 = vmul.f32 %v453_v32, %v969_v1 }
 0x223   : > { %508 = vst [vmem:[%s1112_s10 + $0x10] sm:$0xff] %v492_v30  ;;  %509 = vst [vmem:[%s1112_s10 + $0x18] sm:$0xff] %v493_v31 }
 0x224   : > { %506 = vst [vmem:[%s1112_s10] sm:$0xff] %v490_v33  ;;  %507 = vst [vmem:[%s1112_s10 + $0x8] sm:$0xff] %v491_v34 }
 0x225   : > { %v463_v0 = vpop.permute.xlu1 %462 }
 0x226   : > { %v494_v1 = vmul.f32 %v463_v0, %v971_v2  ;;  %v495_v5 = vmul.f32 %v463_v0, %v975_v4 }
 0x228   : > { %510 = vst [vmem:[%s1112_s10 + $0x20] sm:$0xff] %v494_v1  ;;  %511 = vst [vmem:[%s1112_s10 + $0x28] sm:$0xff] %v495_v5 }
 0x229   : > { %v468_v6 = vpop.permute.xlu1 %467 }
 0x22a   : > { %v496_v35 = vmul.f32 %v468_v6, %v983_v8  ;;  %v497_v36 = vmul.f32 %v468_v6, %v985_v9 }
 0x22c   : > { %512 = vst [vmem:[%s1112_s10 + $0x30] sm:$0xff] %v496_v35  ;;  %513 = vst [vmem:[%s1112_s10 + $0x38] sm:$0xff] %v497_v36 }
 0x22d   : > { %v473_v37 = vpop.permute.xlu1 %472 }
 0x22e   : > { %v498_v2 = vmul.f32 %v473_v37, %v991_v12  ;;  %v499_v4 = vmul.f32 %v473_v37, %v993_v13 }
 0x230   : > { %514 = vst [vmem:[%s1112_s10 + $0x40] sm:$0xff] %v498_v2  ;;  %515 = vst [vmem:[%s1112_s10 + $0x48] sm:$0xff] %v499_v4 }
 0x231   : > { %v478_v38 = vpop.permute.xlu1 %477 }
 0x232   : > { %v500_v39 = vmul.f32 %v478_v38, %v995_v14  ;;  %v501_v8 = vmul.f32 %v478_v38, %v997_v15 }
 0x234   : > { %516 = vst [vmem:[%s1112_s10 + $0x50] sm:$0xff] %v500_v39  ;;  %517 = vst [vmem:[%s1112_s10 + $0x58] sm:$0xff] %v501_v8 }
 0x235   : > { %v483_v9 = vpop.permute.xlu1 %482 }
 0x236   : > { %v502_v40 = vmul.f32 %v483_v9, %v1003_v18  ;;  %v503_v12 = vmul.f32 %v483_v9, %v1005_v19 }
 0x238   : > { %518 = vst [vmem:[%s1112_s10 + $0x60] sm:$0xff] %v502_v40  ;;  %519 = vst [vmem:[%s1112_s10 + $0x68] sm:$0xff] %v503_v12 }
 0x239   : > { %v488_v13 = vpop.permute.xlu1 %487 }
 0x23a   : > { %v504_v14 = vmul.f32 %v488_v13, %v1007_v20  ;;  %v505_v15 = vmul.f32 %v488_v13, %v1009_v21 }
 0x23c   : > { %520 = vst [vmem:[%s1112_s10 + $0x70] sm:$0xff] %v504_v14  ;;  %521 = vst [vmem:[%s1112_s10 + $0x78] sm:$0xff] %v505_v15 }
 0x23d   : > { %761 = shalt.err (!%p758_p2)
}
 0x23e   : > { %s762_s15 = scalar_lea.hbm %s1143_s26, 2048  ;;  %s766_s7 = scalar_lea.hbm %s1198_s5, 4096 }
 0x23f   : > { %p763_p4 = scmp.ne.s32.totalorder %s1143_s26, %s762_s15  ;;  %p767_p9 = scmp.lt.u32.totalorder %s1143_s26, %s1198_s5 }
 0x240   : > { %p768_p1 = scmp.lt.u32.totalorder %s766_s7, %s762_s15  ;;  %p770_p6 = scmp.lt.u32.totalorder %s762_s15, %s1143_s26 }
 0x241   : > { %p764_p5 = pnand %p763_p4, %p1205_p11 }
 0x242   : > { %p769_p3 = por %p768_p1, %p767_p9 }
 0x243   : > { %p765_p7 = pneg %p764_p5 }
 0x244   : > { %p771_p12 = por %p770_p6, %p769_p3 }
 0x246   : > { %p772_p13 = pnand %p771_p12, %p765_p7 }
 0x248   : > { %775 = shalt.err (!%p772_p13)
}
 0x249   : > { %s821_s25 = smov 256   ;;  %s822_s13 = smov 16  }
 0x24a   : > { %635 = dma.vmem_to_hbm [thread:$0]  (%p1205_p11), %s1145_s11, 2048, %s1143_s26, %s523_s22, %s821_s25, %s821_s25, %s822_s13  }
 0x24b PF: > { %s551_s17 = sand.u32 1, %s802_s18   ;;  %p1206_p8 = scmp.ne.s32.totalorder %s1203_s6, 0 }
 0x24c   : > { %p1207_p10 = scmp.ge.s32.totalorder %s814_s21, 2  ;;  %s552_s28 = scalar_lea.sflag [#allocation4], %s551_s17 }
 0x24e   : > { %p642_p0 = pnand %p1207_p10, %p1206_p8 }
 0x250   : > { %797 = dma.done.wait (!%p642_p0), %s552_s28, 2048  }
 0x251   : > { %799 = vsyncadd (!%p642_p0), %s552_s28, 4294965248  ;;  %p18_p2 = scmp.ge.s32.totalorder %s878_s24, 4   ;;  %s1208_s18 = smov %s806_s19 }
 0x252   : > { %s1209_s19 = smov %s810_s20  ;;  %s1210_s20 = smov %s890_s27 }
 0x253   : > { %s1211_s21 = smov %s878_s24  ;;  %20 = sbr.rel (!%p18_p2) target bundleno = 5 (0x5), region = 85 }
 0x25a   :  { %557 = vsyncpa [#allocation3], 1 }
 0x25b   :  { %559 = vsyncpa [#allocation3 + $0x1], 1 }
 0x25c   :  { %560 = vsyncpa [#allocation4], 1 }
 0x25d   :  { %562 = vsyncpa [#allocation4 + $0x1], 1 }

</bundles_post_ra>
